<compile_context>
chip_gen: v5e
topology: v5e:2x2
jax: 0.10.0
libtpu: 0.0.40
codegen_flags: <defaults>
</compile_context>

<pallas_src>
import jax
import jax.numpy as jnp
from jax.experimental import pallas as pl
from jax.experimental.pallas import tpu as pltpu

IN_FEATURES = 3
HIDDEN = 128
OUT_FEATURES = 3
LANE = 128  # lane-dense padded width for input / output features


def _round_up(n, m):
    return ((n + m - 1) // m) * m


def _policy_kernel(x_ref, w1_ref, b1_ref, w2_ref, b2_ref, w3_ref, b3_ref, o_ref):
    # All three matmuls hit the MXU (bf16 in, f32 accumulate); elementwise stays f32.
    h1 = jnp.dot(x_ref[...], w1_ref[...], preferred_element_type=jnp.float32)
    h1 = jnp.maximum(h1 + b1_ref[...], 0.0)
    h2 = jnp.dot(h1.astype(jnp.bfloat16), w2_ref[...], preferred_element_type=jnp.float32)
    h2 = jnp.maximum(h2 + b2_ref[...], 0.0)
    h3 = jnp.dot(h2.astype(jnp.bfloat16), w3_ref[...], preferred_element_type=jnp.float32)
    o_ref[...] = h3 + b3_ref[...]  # lane-dense (TB, 128) f32 store


def init_params(key):
    """Deterministic init mirroring PyTorch nn.Linear default U(-1/sqrt(fan_in), +).
    Weights stored as [in, out] so y = x @ W + b (== PyTorch's x @ W.T + b)."""
    def linear(k, fan_in, fan_out):
        kw, kb = jax.random.split(k)
        bound = 1.0 / jnp.sqrt(jnp.float32(fan_in))
        w = jax.random.uniform(kw, (fan_in, fan_out), jnp.float32, -bound, bound)
        b = jax.random.uniform(kb, (1, fan_out), jnp.float32, -bound, bound)
        return w, b

    k1, k2, k3 = jax.random.split(key, 3)
    w1, b1 = linear(k1, IN_FEATURES, HIDDEN)
    w2, b2 = linear(k2, HIDDEN, HIDDEN)
    w3, b3 = linear(k3, HIDDEN, OUT_FEATURES)
    return w1, b1, w2, b2, w3, b3


def prepare_params(params):
    """One-time static transform: pad K=3 / N=3 dims to lane-dense 128 and cast
    matmul weights to bf16 (accumulation stays f32 inside the kernel)."""
    w1, b1, w2, b2, w3, b3 = params
    w1p = jnp.zeros((LANE, HIDDEN), jnp.float32).at[:IN_FEATURES, :].set(w1)
    w3p = jnp.zeros((HIDDEN, LANE), jnp.float32).at[:, :OUT_FEATURES].set(w3)
    b3p = jnp.zeros((1, LANE), jnp.float32).at[:, :OUT_FEATURES].set(b3)
    return (
        w1p.astype(jnp.bfloat16),
        b1.astype(jnp.float32),
        w2.astype(jnp.bfloat16),
        b2.astype(jnp.float32),
        w3p.astype(jnp.bfloat16),
        b3p,
    )


def policy_net_forward(x, prepared_params, *, block_b=256):
    """x: [B, 3] float32 -> logits [B, 3] float32 (PolicyNet forward)."""
    w1, b1, w2, b2, w3, b3 = prepared_params
    B = x.shape[0]

    # Batch tile: big enough to feed the MXU / amortize per-step overhead on
    # large batches, but never larger than the (sublane-rounded) batch itself.
    tb = min(block_b, _round_up(B, 8))
    b_pad = _round_up(B, tb)

    # Pad input to lane-dense (b_pad, 128); bf16 halves the x DMA bytes.
    x_pad = jnp.zeros((b_pad, LANE), jnp.bfloat16)
    x_pad = x_pad.at[:B, :IN_FEATURES].set(x.astype(jnp.bfloat16))

    grid = (b_pad // tb,)
    tiled = lambda: pl.BlockSpec((tb, LANE), lambda i: (i, 0))        # streamed
    const = lambda a: pl.BlockSpec(a.shape, lambda i: (0,) * a.ndim)  # VMEM-resident

    out_pad = pl.pallas_call(
        _policy_kernel,
        out_shape=jax.ShapeDtypeStruct((b_pad, LANE), jnp.float32),
        grid=grid,
        in_specs=[
            tiled(),               # x
            const(w1), const(b1),  # fc1
            const(w2), const(b2),  # fc2
            const(w3), const(b3),  # fc3 (padded to lane-dense output)
        ],
        out_specs=tiled(),
        compiler_params=pltpu.CompilerParams(
            dimension_semantics=("parallel",),  # megacore split on v7x
        ),
    )(x_pad, w1, b1, w2, b2, w3, b3)

    return out_pad[:B, :OUT_FEATURES]


def reference_forward(x, params):
    """Pure-JAX f32 reference with PyTorch semantics."""
    w1, b1, w2, b2, w3, b3 = params
    h = jnp.maximum(x @ w1 + b1, 0.0)
    h = jnp.maximum(h @ w2 + b2, 0.0)
    return h @ w3 + b3


if __name__ == "__main__":
    key = jax.random.PRNGKey(0)
    kp, kx1, kx2 = jax.random.split(key, 3)
    params = init_params(kp)
    prepared = prepare_params(params)

    # Small demo batch; block_b=32 forces a multi-step grid to exercise the
    # streaming / pipelined path.
    B = 64
    x = jax.random.normal(kx1, (B, IN_FEATURES), jnp.float32)
    out = jax.block_until_ready(policy_net_forward(x, prepared, block_b=32))
    ref = reference_forward(x, params)
    assert out.shape == (B, OUT_FEATURES), out.shape
    # bf16 MXU inputs (f32 accumulate) -> loosened tolerance vs the f32 reference.
    assert jnp.allclose(out, ref, atol=5e-2, rtol=5e-2), "mismatch vs reference (B=64)"

    # Ragged batch (not a multiple of 8) to check the padding path.
    B2 = 5
    x2 = jax.random.normal(kx2, (B2, IN_FEATURES), jnp.float32)
    out2 = jax.block_until_ready(policy_net_forward(x2, prepared))
    ref2 = reference_forward(x2, params)
    assert out2.shape == (B2, OUT_FEATURES), out2.shape
    assert jnp.allclose(out2, ref2, atol=5e-2, rtol=5e-2), "mismatch vs reference (B=5)"

    print("KERNEL_OK")
</pallas_src>

<mosaic_0001>
module attributes {stable_mosaic.version = 11 : i64} {
  func.func @_policy_kernel(%arg0: i32, %arg1: memref<32x128xbf16, #tpu.memory_space<vmem>>, %arg2: memref<128x128xbf16, #tpu.memory_space<vmem>>, %arg3: memref<1x128xf32, #tpu.memory_space<vmem>>, %arg4: memref<128x128xbf16, #tpu.memory_space<vmem>>, %arg5: memref<1x128xf32, #tpu.memory_space<vmem>>, %arg6: memref<128x128xbf16, #tpu.memory_space<vmem>>, %arg7: memref<1x128xf32, #tpu.memory_space<vmem>>, %arg8: memref<32x128xf32, #tpu.memory_space<vmem>>) attributes {dimension_semantics = [#tpu.dimension_semantics<parallel>], iteration_bounds = array<i64: 2>, scalar_prefetch = 0 : i64, scratch_operands = 0 : i64, tpu.core_type = #tpu.core_type<tc>, window_params = [{transform_indices = @transform_0, window_bounds = array<i64: 32, 128>}, {pipeline_mode = #tpu.pipeline_mode<synchronous>, transform_indices = @transform_1, window_bounds = array<i64: 128, 128>}, {pipeline_mode = #tpu.pipeline_mode<synchronous>, transform_indices = @transform_2, window_bounds = array<i64: 1, 128>}, {pipeline_mode = #tpu.pipeline_mode<synchronous>, transform_indices = @transform_3, window_bounds = array<i64: 128, 128>}, {pipeline_mode = #tpu.pipeline_mode<synchronous>, transform_indices = @transform_4, window_bounds = array<i64: 1, 128>}, {pipeline_mode = #tpu.pipeline_mode<synchronous>, transform_indices = @transform_5, window_bounds = array<i64: 128, 128>}, {pipeline_mode = #tpu.pipeline_mode<synchronous>, transform_indices = @transform_6, window_bounds = array<i64: 1, 128>}, {transform_indices = @transform_7, window_bounds = array<i64: 32, 128>}]} {
    %c0 = arith.constant 0 : index
    %c0_0 = arith.constant 0 : index
    %0 = vector.load %arg1[%c0, %c0_0] : memref<32x128xbf16, #tpu.memory_space<vmem>>, vector<32x128xbf16>
    %c0_1 = arith.constant 0 : index
    %c0_2 = arith.constant 0 : index
    %1 = vector.load %arg2[%c0_1, %c0_2] : memref<128x128xbf16, #tpu.memory_space<vmem>>, vector<128x128xbf16>
    %cst = arith.constant dense<0.000000e+00> : vector<32x128xf32>
    %2 = tpu.matmul %0, %1, %cst {dimension_numbers = #tpu.dot_dimension_numbers<[1], [0], [0], [1], [0, 0, 1, 1], [], []>} : vector<32x128xbf16>, vector<128x128xbf16>, vector<32x128xf32> -> vector<32x128xf32>
    %c0_3 = arith.constant 0 : index
    %c0_4 = arith.constant 0 : index
    %3 = vector.load %arg3[%c0_3, %c0_4] : memref<1x128xf32, #tpu.memory_space<vmem>>, vector<1x128xf32>
    %4 = vector.broadcast %3 : vector<1x128xf32> to vector<32x128xf32>
    %5 = arith.addf %2, %4 : vector<32x128xf32>
    %cst_5 = arith.constant 0.000000e+00 : f32
    %6 = vector.broadcast %cst_5 : f32 to vector<32x128xf32>
    %7 = arith.maximumf %5, %6 : vector<32x128xf32>
    %8 = arith.truncf %7 : vector<32x128xf32> to vector<32x128xbf16>
    %c0_6 = arith.constant 0 : index
    %c0_7 = arith.constant 0 : index
    %9 = vector.load %arg4[%c0_6, %c0_7] : memref<128x128xbf16, #tpu.memory_space<vmem>>, vector<128x128xbf16>
    %cst_8 = arith.constant dense<0.000000e+00> : vector<32x128xf32>
    %10 = tpu.matmul %8, %9, %cst_8 {dimension_numbers = #tpu.dot_dimension_numbers<[1], [0], [0], [1], [0, 0, 1, 1], [], []>} : vector<32x128xbf16>, vector<128x128xbf16>, vector<32x128xf32> -> vector<32x128xf32>
    %c0_9 = arith.constant 0 : index
    %c0_10 = arith.constant 0 : index
    %11 = vector.load %arg5[%c0_9, %c0_10] : memref<1x128xf32, #tpu.memory_space<vmem>>, vector<1x128xf32>
    %12 = vector.broadcast %11 : vector<1x128xf32> to vector<32x128xf32>
    %13 = arith.addf %10, %12 : vector<32x128xf32>
    %cst_11 = arith.constant 0.000000e+00 : f32
    %14 = vector.broadcast %cst_11 : f32 to vector<32x128xf32>
    %15 = arith.maximumf %13, %14 : vector<32x128xf32>
    %16 = arith.truncf %15 : vector<32x128xf32> to vector<32x128xbf16>
    %c0_12 = arith.constant 0 : index
    %c0_13 = arith.constant 0 : index
    %17 = vector.load %arg6[%c0_12, %c0_13] : memref<128x128xbf16, #tpu.memory_space<vmem>>, vector<128x128xbf16>
    %cst_14 = arith.constant dense<0.000000e+00> : vector<32x128xf32>
    %18 = tpu.matmul %16, %17, %cst_14 {dimension_numbers = #tpu.dot_dimension_numbers<[1], [0], [0], [1], [0, 0, 1, 1], [], []>} : vector<32x128xbf16>, vector<128x128xbf16>, vector<32x128xf32> -> vector<32x128xf32>
    %c0_15 = arith.constant 0 : index
    %c0_16 = arith.constant 0 : index
    %19 = vector.load %arg7[%c0_15, %c0_16] : memref<1x128xf32, #tpu.memory_space<vmem>>, vector<1x128xf32>
    %20 = vector.broadcast %19 : vector<1x128xf32> to vector<32x128xf32>
    %21 = arith.addf %18, %20 : vector<32x128xf32>
    %c0_17 = arith.constant 0 : index
    %c0_18 = arith.constant 0 : index
    %22 = vector.load %arg8[%c0_17, %c0_18] : memref<32x128xf32, #tpu.memory_space<vmem>>, vector<32x128xf32>
    tpu.vector_store %arg8[%c0_17, %c0_18], %21 {strides = array<i32>} : memref<32x128xf32, #tpu.memory_space<vmem>>, vector<32x128xf32>,
    return
  }
  func.func @transform_0(%arg0: i32) -> (i32, i32) {
    %c0_i32 = arith.constant 0 : i32
    %c0_i32_0 = arith.constant 0 : i32
    return %arg0, %c0_i32 : i32, i32
  }
  func.func @transform_1(%arg0: i32) -> (i32, i32) {
    %c0_i32 = arith.constant 0 : i32
    %c0_i32_0 = arith.constant 0 : i32
    %c0_i32_1 = arith.constant 0 : i32
    return %c0_i32, %c0_i32_0 : i32, i32
  }
  func.func @transform_2(%arg0: i32) -> (i32, i32) {
    %c0_i32 = arith.constant 0 : i32
    %c0_i32_0 = arith.constant 0 : i32
    %c0_i32_1 = arith.constant 0 : i32
    return %c0_i32, %c0_i32_0 : i32, i32
  }
  func.func @transform_3(%arg0: i32) -> (i32, i32) {
    %c0_i32 = arith.constant 0 : i32
    %c0_i32_0 = arith.constant 0 : i32
    %c0_i32_1 = arith.constant 0 : i32
    return %c0_i32, %c0_i32_0 : i32, i32
  }
  func.func @transform_4(%arg0: i32) -> (i32, i32) {
    %c0_i32 = arith.constant 0 : i32
    %c0_i32_0 = arith.constant 0 : i32
    %c0_i32_1 = arith.constant 0 : i32
    return %c0_i32, %c0_i32_0 : i32, i32
  }
  func.func @transform_5(%arg0: i32) -> (i32, i32) {
    %c0_i32 = arith.constant 0 : i32
    %c0_i32_0 = arith.constant 0 : i32
    %c0_i32_1 = arith.constant 0 : i32
    return %c0_i32, %c0_i32_0 : i32, i32
  }
  func.func @transform_6(%arg0: i32) -> (i32, i32) {
    %c0_i32 = arith.constant 0 : i32
    %c0_i32_0 = arith.constant 0 : i32
    %c0_i32_1 = arith.constant 0 : i32
    return %c0_i32, %c0_i32_0 : i32, i32
  }
  func.func @transform_7(%arg0: i32) -> (i32, i32) {
    %c0_i32 = arith.constant 0 : i32
    %c0_i32_0 = arith.constant 0 : i32
    return %arg0, %c0_i32 : i32, i32
  }
}

</mosaic_0001>

<bundles_post_ra>
// kernel: tpu_custom_call.1
= control target key start
LH: loop header
LB: loop body
LE: loop exit
PB: predicated region body
PF: predicated region fallthrough
CT: control target
= control target key end

     0   :  { %s1433_s0 = inlined_call_operand.hbm [shape: bf16[64,128], index: 0, kind: input, shape index: {}]   ;;  %s1434_s1 = inlined_call_operand.hbm [shape: bf16[128,128], index: 1, kind: input, shape index: {}]   ;;  %s1435_s2 = inlined_call_operand.vmem [shape: f32[1,128], index: 2, kind: input, shape index: {}]   ;;  %s1436_s3 = inlined_call_operand.hbm [shape: bf16[128,128], index: 3, kind: input, shape index: {}]   ;;  %s1437_s4 = inlined_call_operand.vmem [shape: f32[1,128], index: 4, kind: input, shape index: {}]   ;;  %s1438_s5 = inlined_call_operand.hbm [shape: bf16[128,128], index: 5, kind: input, shape index: {}]   ;;  %s1439_s6 = inlined_call_operand.vmem [shape: f32[1,128], index: 6, kind: input, shape index: {}]   ;;  %s1440_s7 = inlined_call_operand.hbm [shape: f32[64,128], index: 7, kind: output, shape index: {}]  }
   0x1   :  { %1443 = sst [smem:[#allocation15_spill]] %s1434_s1 }
   0x2   :  { %12 = vsyncpa [#allocation3], 0 }
   0x3   :  { %14 = vsyncpa [#allocation3 + $0x1], 0 }
   0x4   :  { %15 = vsyncpa [#allocation6], 0 }
   0x5   :  { %16 = vsyncpa [#allocation9], 0 }
   0x6   :  { %17 = vsyncpa [#allocation4], 0 }
   0x7   :  { %19 = vsyncpa [#allocation4 + $0x1], 0  ;;  %s1249_s24 = smov 0   ;;  %s1251_s25 = smov 0  }
   0x8   :  { %s1253_s26 = smov 0   ;;  %s1255_s27 = smov 0  }
   0x9 LB: > { %s1270_s28 = sadd.s32 4294967295, %s1200_s27   ;;  %s762_s29 = sadd.s32 4294967294, %s1200_s27   ;;  %s1200_s27 = sphi %s1255_s27, %s1457_s27   ;;  %s1196_s26 = sphi %s1253_s26, %s1456_s26   ;;  %s1192_s25 = sphi %s1251_s25, %s1455_s25   ;;  %s1188_s24 = sphi %s1249_s24, %s1454_s24  }
   0xa   : > { %p45_p0 = scmp.ne.s32.totalorder %s1192_s25, %s1188_s24  ;;  %p46_p1 = scmp.eq.s32.totalorder %s1270_s28, 0 }
   0xb   : > { %p195_p2 = scmp.eq.s32.totalorder %s1270_s28, 1  ;;  %p201_p3 = scmp.eq.s32.totalorder %s762_s29, 1 }
   0xc   : > { %p1279_p4 = por %p46_p1, %p45_p0  ;;  %p763_p5 = scmp.ge.s32.totalorder %s1200_s27, 1 }
   0xd   : > { %p1284_p6 = por %p201_p3, %p45_p0  ;;  %p208_p7 = scmp.lt.s32.totalorder %s1200_s27, 3 }
   0xe   : > { %s1446_s1 = sld [smem:[#allocation15_spill]]  ;;  %s1202_s13 = smov [#allocation5]  }
   0xf   : > { %p1292_p8 = pnand %p763_p5, %p208_p7  ;;  %s221_s14 = sshll.u32 %s1202_s13, 4  ;;  %s222_s14 = int_to_ptr.vmem [resolvable:$true] %s221_s14 }
  0x10   : > { %s236_s18 = sshll.u32 %s1436_s3, 4  ;;  %s1441_s19 = smov 64   ;;  %s237_s18 = int_to_ptr.hbm [resolvable:$true] %s236_s18 }
  0x11   : > { %p938_p9 = pneg %p1292_p8  ;;  %s1442_s20 = smov 4  }
  0x12   : > { %s1205_s21 = smov [#allocation7]   ;;  %s253_s9 = sshll.u32 %s1438_s5, 4  ;;  %s254_s9 = int_to_ptr.hbm [resolvable:$true] %s253_s9 }
  0x13   : > { %p1300_p10 = pnand %p938_p9, %p46_p1  ;;  %s238_s22 = sshll.u32 %s1205_s21, 4  ;;  %s239_s22 = int_to_ptr.vmem [resolvable:$true] %s238_s22 }
  0x14   : > { %s219_s11 = sshll.u32 %s1446_s1, 4  ;;  %s1206_s10 = smov [#allocation8]   ;;  %s220_s11 = int_to_ptr.hbm [resolvable:$true] %s219_s11 }
  0x15   : > { %941 = dma.hbm_to_vmem [thread:$0]  (!%p1300_p10), %s220_s11, 1024, %s222_s14, [#allocation6], %s1441_s19, %s1441_s19, %s1442_s20  }
  0x16   : > { %944 = dma.hbm_to_vmem [thread:$0]  (!%p1300_p10), %s237_s18, 1024, %s239_s22, [#allocation6], %s1441_s19, %s1441_s19, %s1442_s20  }
  0x17   : > { %s255_s11 = sshll.u32 %s1206_s10, 4  ;;  %s1322_s13 = sadd.s32 1, %s1200_s27   ;;  %s256_s11 = int_to_ptr.vmem [resolvable:$true] %s255_s11 }
  0x18   : > { %947 = dma.hbm_to_vmem [thread:$0]  (!%p1300_p10), %s254_s9, 1024, %s256_s11, [#allocation9], %s1441_s19, %s1441_s19, %s1442_s20  }
  0x19   : > { %s29_s14 = ssub.s32 %s1200_s27, %s1322_s13  ;;  %s32_s16 = sadd.s32 1, %s1196_s26 }
  0x1a   : > { %p30_p12 = scmp.eq.s32.totalorder %s29_s14, 0  ;;  %p39_p13 = scmp.ne.s32.totalorder %s1196_s26, %s1192_s25 }
  0x1b   : > { %p40_p0 = scmp.eq.s32.totalorder %s1200_s27, 0  ;;  %p959_p5 = scmp.lt.s32.totalorder %s1200_s27, 2 }
  0x1c   : > { %s1336_s17 = scalar_select %p30_p12, %s1196_s26, %s32_s16  }
  0x1d   : > { %p1340_p3 = por %p195_p2, %p39_p13  ;;  %s272_s21 = sand.u32 1, %s1196_s26  }
  0x1e   : > { %s886_s15 = sshll.u32 %s1200_s27, 4  ;;  %p41_p7 = por %p40_p0, %p39_p13 }
  0x1f   : > { %s768_s22 = sshll.u32 %s272_s21, 4  ;;  %s281_s9 = scalar_lea.hbm %s1433_s0, %s886_s15 }
  0x20   : > { %s282_s10 = sshll.u32 %s281_s9, 4  ;;  %s276_s11 = scalar_lea.vmem [#allocation2], %s768_s22  ;;  %s283_s10 = int_to_ptr.hbm [resolvable:$true] %s282_s10 }
  0x21   : > { %s284_s14 = sshll.u32 %s276_s11, 4  ;;  %p1350_p9 = pnand %p959_p5, %p41_p7  ;;  %s285_s14 = int_to_ptr.vmem [resolvable:$true] %s284_s14 }
  0x22   : > { %s273_s19 = scalar_lea.sflag [#allocation3], %s272_s21  ;;  %s1096_s20 = sshra.s32 %s283_s10, 4  ;;  %s1097_s20 = int_to_ptr.hbm [resolvable:$true] %s1096_s20 }
  0x23   : > { %s1098_s1 = scalar_lea.hbm %s1097_s20, 16  ;;  %p1100_p10 = pneg %p1350_p9 }
  0x24   : > { %p1099_p2 = scmp.ne.s32.totalorder %s1097_s20, %s1098_s1  ;;  %s1103_s22 = scalar_lea.hbm %s1433_s0, 32 }
  0x25   : > { %p1104_p0 = scmp.lt.s32.totalorder %s1097_s20, %s1433_s0  ;;  %p1105_p5 = scmp.lt.s32.totalorder %s1103_s22, %s1098_s1 }
  0x26   : > { %p1101_p12 = pnand %p1100_p10, %p1099_p2 }
  0x27   : > { %p1106_p7 = por %p1105_p5, %p1104_p0 }
  0x28   : > { %p1102_p13 = pneg %p1101_p12 }
  0x2a   : > { %p1107_p11 = pnand %p1106_p7, %p1102_p13 }
  0x2c   : > { %1110 = shalt.err (!%p1107_p11)
}
  0x2d   : > { %s1451_s21 = smov 4   ;;  %s1452_s11 = smov 64  }
  0x2e   : > { %951 = dma.hbm_to_vmem [thread:$0]  (!%p1350_p9), %s283_s10, 256, %s285_s14, %s273_s19, %s1452_s11, %s1452_s11, %s1451_s21  }
  0x2f   : > { %296 = sbr.rel (%p1292_p8) target bundleno = 531 (0x213), region = 48  ;;  %s1370_s15 = sand.u32 (!%p1292_p8), 1, %s1192_s25  }
  0x30   : > { %s772_s20 = sshll.u32 (!%p1292_p8), %s1370_s15, 4  ;;  %s299_s1 = scalar_lea.sflag (!%p1292_p8), [#allocation3], %s1370_s15 }
  0x31   : > { %s1374_s23 = scalar_lea.vmem (!%p1292_p8), [#allocation2], %s772_s20 }
  0x34   : > { %1171 = dma.done.wait (%p1279_p4), %s299_s1, 256  }
  0x35   : > { %1173 = vsyncadd (%p1279_p4), %s299_s1, 4294967040 }
  0x36   : > { %1175 = dma.done.wait (%p46_p1), [#allocation6], 2048  }
  0x37   : > { %1177 = vsyncadd (%p46_p1), [#allocation6], 4294965248 }
  0x38   : > { %1179 = dma.done.wait (%p46_p1), [#allocation9], 1024  }
  0x39   : > { %1181 = vsyncadd (%p46_p1), [#allocation9], 4294966272  ;;  %v896_v0 = vld [vmem:[#allocation5 + $0x38] sm:$0xff]  ;;  %v895_v1 = vld [vmem:[#allocation5 + $0x30] sm:$0xff]  ;;  %s776_s14 = sshll.u32 %s1370_s15, 5  ;;  %s913_s9 = sshll.u32 %s1270_s28, 5 }
  0x3a   : > { %435 = vmatpush.bf16.msra.mxu0 %v896_v0  ;;  %914 = vmatpush.bf16.msra.mxu3 %v896_v0  ;;  %v904_v2 = vld [vmem:[#allocation7 + $0x38] sm:$0xff]  ;;  %v903_v3 = vld [vmem:[#allocation7 + $0x30] sm:$0xff]  ;;  %v894_v4 = vld [vmem:[#allocation5 + $0x28] sm:$0xff]  ;;  %s348_s29 = scalar_lea.vmem [#allocation10], %s776_s14  ;;  %s656_s20 = scalar_lea.hbm %s1440_s7, %s913_s9 }
  0x3b   : > { %528 = vmatpush.bf16.msra.mxu1 %v904_v2  ;;  %v902_v5 = vld [vmem:[#allocation7 + $0x28] sm:$0xff]  ;;  %v893_v6 = vld [vmem:[#allocation5 + $0x20] sm:$0xff]  ;;  %v892_v8 = vld [vmem:[#allocation5 + $0x18] sm:$0xff]  ;;  %s657_s1 = sshll.u32 %s348_s29, 4  ;;  %s645_s30 = scalar_lea.sflag [#allocation4], %s1370_s15  ;;  %s658_s1 = int_to_ptr.vmem [resolvable:$true] %s657_s1 }
  0x3c   : > { %v901_v7 = vld [vmem:[#allocation7 + $0x20] sm:$0xff]  ;;  %v891_v9 = vld [vmem:[#allocation5 + $0x10] sm:$0xff]  ;;  %v890_v10 = vld [vmem:[#allocation5 + $0x8] sm:$0xff]  ;;  %s1146_s14 = scalar_lea.hbm %s1440_s7, 64 }
  0x3d   : > { %v889_v11 = vld [vmem:[#allocation5] sm:$0xff]  ;;  %v888_v13 = vld [vmem:[%s1374_s23 + $0x8] sm:$0xff]  ;;  %v899_v15 = vld [vmem:[#allocation7 + $0x10] sm:$0xff] }
  0x3e   : > { %436 = vmatpush.bf16.msra.mxu0 %v895_v1  ;;  %915 = vmatpush.bf16.msra.mxu3 %v895_v1  ;;  %v887_v12 = vld [vmem:[%s1374_s23] sm:$0xff]  ;;  %v900_v14 = vld [vmem:[#allocation7 + $0x18] sm:$0xff]  ;;  %v898_v16 = vld [vmem:[#allocation7 + $0x8] sm:$0xff]  ;;  %s659_s23 = sshll.u32 %s656_s20, 4  ;;  %s660_s23 = int_to_ptr.hbm [resolvable:$true] %s659_s23 }
  0x3f   : > { %529 = vmatpush.bf16.msra.mxu1 %v903_v3  ;;  %v897_v17 = vld [vmem:[#allocation7] sm:$0xff]  ;;  %v912_v18 = vld [vmem:[#allocation8 + $0x38] sm:$0xff]  ;;  %v911_v20 = vld [vmem:[#allocation8 + $0x30] sm:$0xff]  ;;  %s1140_s12 = sshra.s32 %s660_s23, 4  ;;  %s1141_s12 = int_to_ptr.hbm [resolvable:$true] %s1140_s12 }
  0x40   : > { %621 = vmatpush.bf16.msra.mxu2 %v912_v18  ;;  %v1003_v21 = vld [vmem:[%s1435_s2] ss:$0 sm:$0xff]  ;;  %v910_v22 = vld [vmem:[#allocation8 + $0x28] sm:$0xff]  ;;  %v908_v37 = vld [vmem:[#allocation8 + $0x18] sm:$0xff]  ;;  %s1142_s19 = scalar_lea.hbm %s1141_s12, 32  ;;  %p1147_p11 = scmp.lt.s32.totalorder %s1141_s12, %s1440_s7 }
  0x41   : > { %v909_v27 = vld [vmem:[#allocation8 + $0x20] sm:$0xff]  ;;  %v907_v38 = vld [vmem:[#allocation8 + $0x10] sm:$0xff]  ;;  %v906_v39 = vld [vmem:[#allocation8 + $0x8] sm:$0xff]  ;;  %p1143_p1 = scmp.ne.s32.totalorder %s1141_s12, %s1142_s19  ;;  %p1148_p9 = scmp.lt.s32.totalorder %s1146_s14, %s1142_s19 }
  0x42   : > { %437 = vmatpush.bf16.msra.mxu0 %v894_v4  ;;  %916 = vmatpush.bf16.msra.mxu3 %v894_v4  ;;  %v905_v40 = vld [vmem:[#allocation8] sm:$0xff] }
  0x43   : > { %530 = vmatpush.bf16.msra.mxu1 %v902_v5  ;;  %v1004_v42 = vld [vmem:[%s1437_s4] ss:$0 sm:$0xff]  ;;  %p1144_p4 = pnand %p1143_p1, %p1340_p3  ;;  %p1149_p2 = por %p1148_p9, %p1147_p11 }
  0x44   : > { %622 = vmatpush.bf16.msra.mxu2 %v911_v20  ;;  %v1005_v56 = vld [vmem:[%s1439_s6] ss:$0 sm:$0xff] }
  0x45   : > { %p1145_p8 = pneg %p1144_p4 }
  0x46   : > { %438 = vmatpush.bf16.msra.mxu0 %v893_v6  ;;  %917 = vmatpush.bf16.msra.mxu3 %v893_v6 }
  0x47   : > { %531 = vmatpush.bf16.msra.mxu1 %v901_v7  ;;  %p1150_p10 = pnand %p1149_p2, %p1145_p8 }
  0x48   : > { %623 = vmatpush.bf16.msra.mxu2 %v910_v22 }
  0x4a   : > { %439 = vmatpush.bf16.msra.mxu0 %v892_v8  ;;  %918 = vmatpush.bf16.msra.mxu3 %v892_v8 }
  0x4b   : > { %532 = vmatpush.bf16.msra.mxu1 %v900_v14 }
  0x4c   : > { %624 = vmatpush.bf16.msra.mxu2 %v909_v27 }
  0x4e   : > { %440 = vmatpush.bf16.msra.mxu0 %v891_v9  ;;  %919 = vmatpush.bf16.msra.mxu3 %v891_v9 }
  0x4f   : > { %533 = vmatpush.bf16.msra.mxu1 %v899_v15 }
  0x50   : > { %625 = vmatpush.bf16.msra.mxu2 %v908_v37 }
  0x52   : > { %441 = vmatpush.bf16.msra.mxu0 %v890_v10  ;;  %920 = vmatpush.bf16.msra.mxu3 %v890_v10 }
  0x53   : > { %534 = vmatpush.bf16.msra.mxu1 %v898_v16 }
  0x54   : > { %626 = vmatpush.bf16.msra.mxu2 %v907_v38 }
  0x56   : > { %442 = vmatpush.bf16.msra.mxu0 %v889_v11  ;;  %921 = vmatpush.bf16.msra.mxu3 %v889_v11 }
  0x57   : > { %535 = vmatpush.bf16.msra.mxu1 %v897_v17 }
  0x58   : > { %627 = vmatpush.bf16.msra.mxu2 %v906_v39 }
  0x59   : > { %443 = vmatmul.bf16.vlgmr.msra.gmra.mxu0 %v887_v12  ;;  %448 = vmatmul.bf16.vlgmr.msra.gmra.mxu3 %v888_v13 }
  0x5c   : > { %628 = vmatpush.bf16.msra.mxu2 %v905_v40 }
  0xd6   : > { %v444_v19 = vpop.f32.mrf.mxu0 }
  0xd7   : > { %v445_v23 = vadd.f32 %v1003_v21, %v444_v19 }
  0xd9   : > { %v454_v28 = vmax.f32 %v445_v23, 0.0 }
  0xdc   : > { %v449_v25 = vpop.f32.mrf.mxu3 }
  0xdd   : > { %v450_v32 = vadd.f32 %v1003_v21, %v449_v25 }
  0xde   : > { %v446_v24 = vpop.f32.mrf.mxu0 }
  0xdf   : > { %v447_v26 = vadd.f32 %v1003_v21, %v446_v24  ;;  %v456_v34 = vmax.f32 %v450_v32, 0.0 }
  0xe1   : > { %v455_v29 = vmax.f32 %v447_v26, 0.0 }
  0xe3   : > { %v458_v30 = vpack.c.bf16 %v455_v29, %v454_v28 }
  0xe4   : > { %v451_v31 = vpop.f32.mrf.mxu3 }
  0xe5   : > { %536 = vmatmul.bf16.vlgmr.msra.gmra.mxu1 %v458_v30  ;;  %v452_v33 = vadd.f32 %v1003_v21, %v451_v31 }
  0xe7   : > { %v457_v35 = vmax.f32 %v452_v33, 0.0 }
  0xe9   : > { %v459_v36 = vpack.c.bf16 %v457_v35, %v456_v34 }
  0xf5   : > { %541 = vmatmul.bf16.gmra.mxu1 %v459_v36 }
 0x162   : > { %v537_v41 = vpop.f32.mrf.mxu1 }
 0x163   : > { %v538_v43 = vadd.f32 %v1004_v42, %v537_v41 }
 0x165   : > { %v547_v46 = vmax.f32 %v538_v43, 0.0 }
 0x16a   : > { %v539_v44 = vpop.f32.mrf.mxu1 }
 0x16b   : > { %v540_v45 = vadd.f32 %v1004_v42, %v539_v44 }
 0x16d   : > { %v548_v47 = vmax.f32 %v540_v45, 0.0 }
 0x16f   : > { %v551_v48 = vpack.c.bf16 %v548_v47, %v547_v46 }
 0x171   : > { %629 = vmatmul.bf16.vlgmr.msra.gmra.mxu2 %v551_v48 }
 0x172   : > { %v542_v49 = vpop.f32.mrf.mxu1 }
 0x173   : > { %v543_v50 = vadd.f32 %v1004_v42, %v542_v49 }
 0x175   : > { %v549_v53 = vmax.f32 %v543_v50, 0.0 }
 0x17a   : > { %v544_v51 = vpop.f32.mrf.mxu1 }
 0x17b   : > { %v545_v52 = vadd.f32 %v1004_v42, %v544_v51 }
 0x17d   : > { %v550_v54 = vmax.f32 %v545_v52, 0.0 }
 0x17f   : > { %v552_v55 = vpack.c.bf16 %v550_v54, %v549_v53 }
 0x181   : > { %634 = vmatmul.bf16.gmra.mxu2 %v552_v55 }
 0x1f4   : > { %v630_v57 = vpop.f32.mrf.mxu2 }
 0x1f5   : > { %v631_v58 = vadd.f32 %v1005_v56, %v630_v57 }
 0x1f7   : > { %640 = vst [vmem:[%s348_s29] sm:$0xff] %v631_v58 }
 0x1fc   : > { %v632_v59 = vpop.f32.mrf.mxu2 }
 0x1fd   : > { %v633_v60 = vadd.f32 %v1005_v56, %v632_v59 }
 0x1ff   : > { %641 = vst [vmem:[%s348_s29 + $0x8] sm:$0xff] %v633_v60 }
 0x204   : > { %v635_v61 = vpop.f32.mrf.mxu2 }
 0x205   : > { %v636_v62 = vadd.f32 %v1005_v56, %v635_v61 }
 0x207   : > { %642 = vst [vmem:[%s348_s29 + $0x10] sm:$0xff] %v636_v62 }
 0x20c   : > { %v637_v63 = vpop.f32.mrf.mxu2 }
 0x20d   : > { %v638_v0 = vadd.f32 %v1005_v56, %v637_v63 }
 0x20f   : > { %643 = vst [vmem:[%s348_s29 + $0x18] sm:$0xff] %v638_v0 }
 0x210   : > { %1153 = shalt.err (!%p1150_p10)
}
 0x211   : > { %s1207_s15 = smov 128   ;;  %s1208_s29 = smov 8  }
 0x212   : > { %936 = dma.vmem_to_hbm [thread:$0]  (%p1340_p3), %s658_s1, 512, %s660_s23, %s645_s30, %s1207_s15, %s1207_s15, %s1208_s29  }
 0x213 PF: > { %s674_s9 = sand.u32 1, %s1188_s24   ;;  %p1453_p12 = scmp.ge.s32.totalorder %s1200_s27, 2 }
 0x214   : > { %s675_s21 = scalar_lea.sflag [#allocation4], %s674_s9 }
 0x215   : > { %p953_p13 = pnand %p1453_p12, %p1284_p6 }
 0x217   : > { %p954_p0 = pneg %p953_p13 }
 0x219   : > { %1183 = dma.done.wait (%p954_p0), %s675_s21, 512  }
 0x21a   : > { %1185 = vsyncadd (%p954_p0), %s675_s21, 4294966784  ;;  %p22_p5 = scmp.ge.s32.totalorder %s1322_s13, 4   ;;  %s1454_s24 = smov %s1192_s25 }
 0x21b   : > { %s1455_s25 = smov %s1196_s26  ;;  %s1456_s26 = smov %s1336_s17 }
 0x21c   : > { %s1457_s27 = smov %s1322_s13  ;;  %24 = sbr.rel (!%p22_p5) target bundleno = 9 (0x9), region = 105 }
 0x221   :  { %681 = vsyncpa [#allocation3], 1 }
 0x222   :  { %683 = vsyncpa [#allocation3 + $0x1], 1 }
 0x223   :  { %684 = vsyncpa [#allocation6], 1 }
 0x224   :  { %685 = vsyncpa [#allocation9], 1 }
 0x225   :  { %686 = vsyncpa [#allocation4], 1 }
 0x226   :  { %688 = vsyncpa [#allocation4 + $0x1], 1 }

</bundles_post_ra>
